<compile_context>
chip_gen: v6e
topology: v6e:2x2x1
jax: 0.10.0
libtpu: 0.0.40
codegen_flags: <defaults>
</compile_context>

<pallas_src>
import functools

import jax
import jax.numpy as jnp
from jax import lax
from jax.experimental import pallas as pl
from jax.experimental.pallas import tpu as pltpu


def _mha_kernel(x_ref, wq_ref, wkv_ref, wo_ref, b_ref, o_ref, kv_ref, *,
                heads, head_dim, q_tile, mm_dtype, approx_recip):
    C = heads * head_dim
    t = pl.program_id(1)

    # K/V projections for the whole sequence: computed once per batch element
    # (first q-tile) and kept resident in VMEM scratch across q-tiles.
    @pl.when(t == 0)
    def _():
        x_all = x_ref[0].astype(mm_dtype)                        # (L, C)
        kv = jnp.dot(x_all, wkv_ref[...],                        # (L, 2C), f32 acc
                     preferred_element_type=jnp.float32)
        kv_ref[...] = kv.astype(mm_dtype)

    # Query projection only for this tile's rows. Wq is pre-transposed,
    # pre-cast and already carries the softmax scale (channels**-0.5).
    q_start = pl.multiple_of(t * q_tile, q_tile)
    xq = x_ref[0, pl.ds(q_start, q_tile), :].astype(mm_dtype)    # (TQ, C)
    q = jnp.dot(xq, wq_ref[...],
                preferred_element_type=jnp.float32).astype(mm_dtype)

    kv = kv_ref[...]                                             # (L, 2C), mm_dtype

    head_outs = []
    for h in range(heads):                                       # static unroll
        lo = h * head_dim
        qh = q[:, lo:lo + head_dim]                              # (TQ, D), pre-scaled
        kh = kv[:, lo:lo + head_dim]                             # (L,  D)
        vh = kv[:, C + lo:C + lo + head_dim]                     # (L,  D)

        # scores = q @ k^T without materializing a transpose (contract dim 1).
        s = lax.dot_general(qh, kh, (((1,), (1,)), ((), ())),
                            preferred_element_type=jnp.float32)  # (TQ, L)
        s = s - jnp.max(s, axis=-1, keepdims=True)
        p = jnp.exp(s)                                           # unnormalized probs
        denom = jnp.sum(p, axis=-1, keepdims=True)               # (TQ, 1)

        pv = jnp.dot(p.astype(mm_dtype), vh,
                     preferred_element_type=jnp.float32)         # (TQ, D)

        # Deferred softmax normalization: O(TQ*D) instead of O(TQ*L).
        if approx_recip:
            head_outs.append(pv * pl.reciprocal(denom, approx=True))
        else:
            head_outs.append(pv / denom)

    # Assemble the full (TQ, C) attention output in registers, then ONE
    # full-C output projection (+bias) and a single lane-dense store.
    o_all = jnp.concatenate(head_outs, axis=-1).astype(mm_dtype)  # (TQ, C)
    out = jnp.dot(o_all, wo_ref[...],
                  preferred_element_type=jnp.float32) + b_ref[...]
    o_ref[0] = out.astype(o_ref.dtype)


def _pick_q_tile(L, target=512):
    """Largest q-tile <= target that divides L and keeps sublane alignment."""
    if L <= target:
        return L
    start = target - (target % 8)
    for t in range(start, 7, -8):
        if L % t == 0:
            return t
    return L  # fall back to whole-L blocks


def conv_multi_head_attention(x, wq, wk, wv, wo, bo, heads, *,
                              mm_dtype=jnp.bfloat16, q_tile=None):
    """x: (N, C, L) f32.  wq/wk/wv/wo: (C, C) Conv1d(k=1) weights.  bo: (C,)."""
    N, C, L = x.shape
    D = C // heads
    assert D * heads == C, "channels must be divisible by heads"

    if q_tile is None:
        q_tile = _pick_q_tile(L)
    assert L % q_tile == 0 and (q_tile % 8 == 0 or q_tile == L)
    n_qt = L // q_tile

    # TODO(synk): a channel-major ((C, L), L on lanes) kernel would drop both
    # host-side transposes (one full HBM pass over the activations each).
    xt = jnp.transpose(x, (0, 2, 1))                      # (N, L, C): C on lanes

    scale = float(C) ** (-0.5)                            # embedding_size ** -0.5
    # Host-side weight prep: transpose, fold scale into Wq, fuse K/V into one
    # operand, cast to the matmul dtype.
    wq_t = (wq * scale).T.astype(mm_dtype)                          # (C, C)
    wkv_t = jnp.concatenate([wk.T, wv.T], axis=1).astype(mm_dtype)  # (C, 2C)
    wo_t = wo.T.astype(mm_dtype)                                    # (C, C)
    bias = bo.reshape(1, C).astype(jnp.float32)

    kernel = functools.partial(
        _mha_kernel, heads=heads, head_dim=D, q_tile=q_tile,
        mm_dtype=mm_dtype, approx_recip=(mm_dtype != jnp.float32))

    mm_bytes = jnp.dtype(mm_dtype).itemsize
    # Rough VMEM budget: double-buffered x/out blocks, weights + bias, the
    # persistent K/V scratch and a few (TQ, L) f32 transients.
    vmem_est = (2 * L * C * 4 + 2 * q_tile * C * 4
                + 2 * (4 * C * C + C) * mm_bytes
                + 2 * L * C * mm_bytes
                + 6 * q_tile * L * 4 + 8 * q_tile * C * 4)
    vmem_limit = int(min(110 * 2**20, max(32 * 2**20, 2 * vmem_est)))

    # NOTE: the weight / bias BlockSpecs are grid-invariant (never re-DMA'd);
    # on VMEM-tight configs (v7x, 64 MiB) they can additionally be marked
    # pipeline_mode=pl.Buffered(1) to drop their second pipeline buffer.
    out = pl.pallas_call(
        kernel,
        out_shape=jax.ShapeDtypeStruct((N, L, C), x.dtype),
        grid_spec=pltpu.PrefetchScalarGridSpec(
            num_scalar_prefetch=0,
            grid=(N, n_qt),
            in_specs=[
                pl.BlockSpec((1, L, C), lambda n, t: (n, 0, 0)),   # x (full L / batch)
                pl.BlockSpec((C, C), lambda n, t: (0, 0)),         # Wq^T (scaled)
                pl.BlockSpec((C, 2 * C), lambda n, t: (0, 0)),     # [Wk^T | Wv^T]
                pl.BlockSpec((C, C), lambda n, t: (0, 0)),         # Wout^T
                pl.BlockSpec((1, C), lambda n, t: (0, 0)),         # bias
            ],
            out_specs=pl.BlockSpec((1, q_tile, C), lambda n, t: (n, t, 0)),
            scratch_shapes=[pltpu.VMEM((L, 2 * C), mm_dtype)],      # persistent K/V
        ),
        compiler_params=pltpu.CompilerParams(
            dimension_semantics=("parallel", "arbitrary"),
            vmem_limit_bytes=vmem_limit),
    )(xt, wq_t, wkv_t, wo_t, bias)

    return jnp.transpose(out, (0, 2, 1))                  # back to (N, C, L)


def _reference(x, wq, wk, wv, wo, bo, heads):
    """Plain-JAX mirror of the PyTorch forward, for verification."""
    N, C, L = x.shape
    D = C // heads

    def proj(w):  # Conv1d kernel_size=1, no bias
        return jnp.einsum('oc,ncl->nol', w, x)

    def rearr(t):  # 'n (h d) l -> n l h d'
        return jnp.transpose(t.reshape(N, heads, D, L), (0, 3, 1, 2))

    q, k, v = rearr(proj(wq)), rearr(proj(wk)), rearr(proj(wv))
    qk = jnp.einsum('nqhd,nkhd->nhqk', q, k)
    attn = jax.nn.softmax(qk * (C ** -0.5), axis=3)
    out = jnp.einsum('nhql,nlhd->nqhd', attn, v)
    out = jnp.transpose(out, (0, 2, 3, 1)).reshape(N, C, L)  # 'n l h d -> n (h d) l'
    return jnp.einsum('oc,ncl->nol', wo, out) + bo[None, :, None]


if __name__ == "__main__":
    N, C, L, HEADS = 2, 32, 16, 4

    key = jax.random.PRNGKey(0)
    kx, kq, kk, kv, ko, kb = jax.random.split(key, 6)

    x = jax.random.normal(kx, (N, C, L), dtype=jnp.float32)
    # Conv1d(channels, channels, k=1) weights are (C_out, C_in, 1); squeeze k.
    wq = jax.random.normal(kq, (C, C), dtype=jnp.float32) * (C ** -0.5)
    wk = jax.random.normal(kk, (C, C), dtype=jnp.float32) * (C ** -0.5)
    wv = jax.random.normal(kv, (C, C), dtype=jnp.float32) * (C ** -0.5)
    wo = jax.random.normal(ko, (C, C), dtype=jnp.float32) * (C ** -0.5)
    bo = jax.random.normal(kb, (C,), dtype=jnp.float32) * 0.1

    y_ref = _reference(x, wq, wk, wv, wo, bo, HEADS)

    # Default path: bf16 MXU operands, f32 accumulation.
    y_bf16 = conv_multi_head_attention(x, wq, wk, wv, wo, bo, HEADS)
    y_bf16 = jax.block_until_ready(y_bf16)

    # Strict f32 path (exact match to the f32 reference).
    y_f32 = conv_multi_head_attention(x, wq, wk, wv, wo, bo, HEADS,
                                      mm_dtype=jnp.float32)
    y_f32 = jax.block_until_ready(y_f32)

    assert y_bf16.shape == (N, C, L)
    assert y_f32.shape == (N, C, L)
    assert jnp.allclose(y_f32, y_ref, atol=1e-4, rtol=1e-4), "f32 mismatch"
    assert jnp.allclose(y_bf16, y_ref, atol=5e-2, rtol=5e-2), "bf16 mismatch"

    print("KERNEL_OK")
</pallas_src>

<mosaic_0001>
module attributes {stable_mosaic.version = 11 : i64} {
  func.func @_mha_kernel(%arg0: i32, %arg1: i32, %arg2: memref<1x16x32xf32, #tpu.memory_space<vmem>>, %arg3: memref<32x32xbf16, #tpu.memory_space<vmem>>, %arg4: memref<32x64xbf16, #tpu.memory_space<vmem>>, %arg5: memref<32x32xbf16, #tpu.memory_space<vmem>>, %arg6: memref<1x32xf32, #tpu.memory_space<vmem>>, %arg7: memref<1x16x32xf32, #tpu.memory_space<vmem>>, %arg8: memref<16x64xbf16, #tpu.memory_space<vmem>>) attributes {dimension_semantics = [#tpu.dimension_semantics<parallel>, #tpu.dimension_semantics<arbitrary>], iteration_bounds = array<i64: 2, 1>, scalar_prefetch = 0 : i64, scratch_operands = 1 : i64, tpu.core_type = #tpu.core_type<tc>, window_params = [{transform_indices = @transform_0, window_bounds = array<i64: 1, 16, 32>}, {pipeline_mode = #tpu.pipeline_mode<synchronous>, transform_indices = @transform_1, window_bounds = array<i64: 32, 32>}, {pipeline_mode = #tpu.pipeline_mode<synchronous>, transform_indices = @transform_2, window_bounds = array<i64: 32, 64>}, {pipeline_mode = #tpu.pipeline_mode<synchronous>, transform_indices = @transform_3, window_bounds = array<i64: 32, 32>}, {pipeline_mode = #tpu.pipeline_mode<synchronous>, transform_indices = @transform_4, window_bounds = array<i64: 1, 32>}, {transform_indices = @transform_5, window_bounds = array<i64: 1, 16, 32>}]} {
    %c0_i32 = arith.constant 0 : i32
    %0 = arith.cmpi eq, %arg1, %c0_i32 : i32
    %1 = arith.extui %0 : i1 to i32
    %c0_i32_0 = arith.constant 0 : i32
    %2 = arith.cmpi ne, %1, %c0_i32_0 : i32
    scf.if %2 {
      %c0_30 = arith.constant 0 : index
      %c0_31 = arith.constant 0 : index
      %c0_32 = arith.constant 0 : index
      %87 = vector.load %arg2[%c0_30, %c0_31, %c0_32] : memref<1x16x32xf32, #tpu.memory_space<vmem>>, vector<1x16x32xf32>
      %88 = vector.shape_cast %87 : vector<1x16x32xf32> to vector<16x32xf32>
      %89 = arith.truncf %88 : vector<16x32xf32> to vector<16x32xbf16>
      %c0_33 = arith.constant 0 : index
      %c0_34 = arith.constant 0 : index
      %90 = vector.load %arg4[%c0_33, %c0_34] : memref<32x64xbf16, #tpu.memory_space<vmem>>, vector<32x64xbf16>
      %cst_35 = arith.constant dense<0.000000e+00> : vector<16x64xf32>
      %91 = tpu.matmul %89, %90, %cst_35 {dimension_numbers = #tpu.dot_dimension_numbers<[1], [0], [0], [1], [0, 0, 1, 1], [], []>} : vector<16x32xbf16>, vector<32x64xbf16>, vector<16x64xf32> -> vector<16x64xf32>
      %92 = arith.truncf %91 : vector<16x64xf32> to vector<16x64xbf16>
      %c0_36 = arith.constant 0 : index
      %c0_37 = arith.constant 0 : index
      %93 = vector.load %arg8[%c0_36, %c0_37] : memref<16x64xbf16, #tpu.memory_space<vmem>>, vector<16x64xbf16>
      tpu.vector_store %arg8[%c0_36, %c0_37], %92 {strides = array<i32>} : memref<16x64xbf16, #tpu.memory_space<vmem>>, vector<16x64xbf16>,
    } else {
    }
    %c16_i32 = arith.constant 16 : i32
    %3 = arith.muli %arg1, %c16_i32 : i32
    %4 = tpu.assume_multiple %3, 16 : i32
    %c0 = arith.constant 0 : index
    %5 = arith.index_cast %4 : i32 to index
    %c0_1 = arith.constant 0 : index
    %6 = vector.load %arg2[%c0, %5, %c0_1] : memref<1x16x32xf32, #tpu.memory_space<vmem>>, vector<1x16x32xf32>
    %7 = vector.shape_cast %6 : vector<1x16x32xf32> to vector<16x32xf32>
    %8 = arith.truncf %7 : vector<16x32xf32> to vector<16x32xbf16>
    %c0_2 = arith.constant 0 : index
    %c0_3 = arith.constant 0 : index
    %9 = vector.load %arg3[%c0_2, %c0_3] : memref<32x32xbf16, #tpu.memory_space<vmem>>, vector<32x32xbf16>
    %cst = arith.constant dense<0.000000e+00> : vector<16x32xf32>
    %10 = tpu.matmul %8, %9, %cst {dimension_numbers = #tpu.dot_dimension_numbers<[1], [0], [0], [1], [0, 0, 1, 1], [], []>} : vector<16x32xbf16>, vector<32x32xbf16>, vector<16x32xf32> -> vector<16x32xf32>
    %11 = arith.truncf %10 : vector<16x32xf32> to vector<16x32xbf16>
    %c0_4 = arith.constant 0 : index
    %c0_5 = arith.constant 0 : index
    %12 = vector.load %arg8[%c0_4, %c0_5] : memref<16x64xbf16, #tpu.memory_space<vmem>>, vector<16x64xbf16>
    %13 = vector.extract_strided_slice %11 {offsets = [0, 0], sizes = [16, 8], strides = [1, 1]} : vector<16x32xbf16> to vector<16x8xbf16>
    %14 = vector.extract_strided_slice %12 {offsets = [0, 0], sizes = [16, 8], strides = [1, 1]} : vector<16x64xbf16> to vector<16x8xbf16>
    %15 = vector.extract_strided_slice %12 {offsets = [0, 32], sizes = [16, 8], strides = [1, 1]} : vector<16x64xbf16> to vector<16x8xbf16>
    %cst_6 = arith.constant dense<0.000000e+00> : vector<16x16xf32>
    %16 = tpu.matmul %13, %14, %cst_6 {dimension_numbers = #tpu.dot_dimension_numbers<[1], [1], [0], [0], [0, 0, 1, 0], [], []>} : vector<16x8xbf16>, vector<16x8xbf16>, vector<16x16xf32> -> vector<16x16xf32>
    %cst_7 = arith.constant dense<0xFF800000> : vector<16xf32>
    %17 = vector.multi_reduction <maximumf>, %16, %cst_7 [1] : vector<16x16xf32> to vector<16xf32>
    %18 = vector.shape_cast %17 : vector<16xf32> to vector<16x1xf32>
    %19 = vector.broadcast %18 : vector<16x1xf32> to vector<16x16xf32>
    %20 = arith.subf %16, %19 : vector<16x16xf32>
    %21 = math.exp %20 : vector<16x16xf32>
    %cst_8 = arith.constant dense<0.000000e+00> : vector<16xf32>
    %22 = vector.multi_reduction <add>, %21, %cst_8 [1] : vector<16x16xf32> to vector<16xf32>
    %23 = vector.shape_cast %22 : vector<16xf32> to vector<16x1xf32>
    %24 = arith.truncf %21 : vector<16x16xf32> to vector<16x16xbf16>
    %cst_9 = arith.constant dense<0.000000e+00> : vector<16x8xf32>
    %25 = tpu.matmul %24, %15, %cst_9 {dimension_numbers = #tpu.dot_dimension_numbers<[1], [0], [0], [1], [0, 0, 1, 1], [], []>} : vector<16x16xbf16>, vector<16x8xbf16>, vector<16x8xf32> -> vector<16x8xf32>
    %26 = tpu.reciprocal %23 {approx = true} : vector<16x1xf32> -> vector<16x1xf32>
    %27 = vector.broadcast %26 : vector<16x1xf32> to vector<16x8xf32>
    %28 = arith.mulf %25, %27 : vector<16x8xf32>
    %29 = vector.extract_strided_slice %11 {offsets = [0, 8], sizes = [16, 8], strides = [1, 1]} : vector<16x32xbf16> to vector<16x8xbf16>
    %30 = vector.extract_strided_slice %12 {offsets = [0, 8], sizes = [16, 8], strides = [1, 1]} : vector<16x64xbf16> to vector<16x8xbf16>
    %31 = vector.extract_strided_slice %12 {offsets = [0, 40], sizes = [16, 8], strides = [1, 1]} : vector<16x64xbf16> to vector<16x8xbf16>
    %cst_10 = arith.constant dense<0.000000e+00> : vector<16x16xf32>
    %32 = tpu.matmul %29, %30, %cst_10 {dimension_numbers = #tpu.dot_dimension_numbers<[1], [1], [0], [0], [0, 0, 1, 0], [], []>} : vector<16x8xbf16>, vector<16x8xbf16>, vector<16x16xf32> -> vector<16x16xf32>
    %cst_11 = arith.constant dense<0xFF800000> : vector<16xf32>
    %33 = vector.multi_reduction <maximumf>, %32, %cst_11 [1] : vector<16x16xf32> to vector<16xf32>
    %34 = vector.shape_cast %33 : vector<16xf32> to vector<16x1xf32>
    %35 = vector.broadcast %34 : vector<16x1xf32> to vector<16x16xf32>
    %36 = arith.subf %32, %35 : vector<16x16xf32>
    %37 = math.exp %36 : vector<16x16xf32>
    %cst_12 = arith.constant dense<0.000000e+00> : vector<16xf32>
    %38 = vector.multi_reduction <add>, %37, %cst_12 [1] : vector<16x16xf32> to vector<16xf32>
    %39 = vector.shape_cast %38 : vector<16xf32> to vector<16x1xf32>
    %40 = arith.truncf %37 : vector<16x16xf32> to vector<16x16xbf16>
    %cst_13 = arith.constant dense<0.000000e+00> : vector<16x8xf32>
    %41 = tpu.matmul %40, %31, %cst_13 {dimension_numbers = #tpu.dot_dimension_numbers<[1], [0], [0], [1], [0, 0, 1, 1], [], []>} : vector<16x16xbf16>, vector<16x8xbf16>, vector<16x8xf32> -> vector<16x8xf32>
    %42 = tpu.reciprocal %39 {approx = true} : vector<16x1xf32> -> vector<16x1xf32>
    %43 = vector.broadcast %42 : vector<16x1xf32> to vector<16x8xf32>
    %44 = arith.mulf %41, %43 : vector<16x8xf32>
    %45 = vector.extract_strided_slice %11 {offsets = [0, 16], sizes = [16, 8], strides = [1, 1]} : vector<16x32xbf16> to vector<16x8xbf16>
    %46 = vector.extract_strided_slice %12 {offsets = [0, 16], sizes = [16, 8], strides = [1, 1]} : vector<16x64xbf16> to vector<16x8xbf16>
    %47 = vector.extract_strided_slice %12 {offsets = [0, 48], sizes = [16, 8], strides = [1, 1]} : vector<16x64xbf16> to vector<16x8xbf16>
    %cst_14 = arith.constant dense<0.000000e+00> : vector<16x16xf32>
    %48 = tpu.matmul %45, %46, %cst_14 {dimension_numbers = #tpu.dot_dimension_numbers<[1], [1], [0], [0], [0, 0, 1, 0], [], []>} : vector<16x8xbf16>, vector<16x8xbf16>, vector<16x16xf32> -> vector<16x16xf32>
    %cst_15 = arith.constant dense<0xFF800000> : vector<16xf32>
    %49 = vector.multi_reduction <maximumf>, %48, %cst_15 [1] : vector<16x16xf32> to vector<16xf32>
    %50 = vector.shape_cast %49 : vector<16xf32> to vector<16x1xf32>
    %51 = vector.broadcast %50 : vector<16x1xf32> to vector<16x16xf32>
    %52 = arith.subf %48, %51 : vector<16x16xf32>
    %53 = math.exp %52 : vector<16x16xf32>
    %cst_16 = arith.constant dense<0.000000e+00> : vector<16xf32>
    %54 = vector.multi_reduction <add>, %53, %cst_16 [1] : vector<16x16xf32> to vector<16xf32>
    %55 = vector.shape_cast %54 : vector<16xf32> to vector<16x1xf32>
    %56 = arith.truncf %53 : vector<16x16xf32> to vector<16x16xbf16>
    %cst_17 = arith.constant dense<0.000000e+00> : vector<16x8xf32>
    %57 = tpu.matmul %56, %47, %cst_17 {dimension_numbers = #tpu.dot_dimension_numbers<[1], [0], [0], [1], [0, 0, 1, 1], [], []>} : vector<16x16xbf16>, vector<16x8xbf16>, vector<16x8xf32> -> vector<16x8xf32>
    %58 = tpu.reciprocal %55 {approx = true} : vector<16x1xf32> -> vector<16x1xf32>
    %59 = vector.broadcast %58 : vector<16x1xf32> to vector<16x8xf32>
    %60 = arith.mulf %57, %59 : vector<16x8xf32>
    %61 = vector.extract_strided_slice %11 {offsets = [0, 24], sizes = [16, 8], strides = [1, 1]} : vector<16x32xbf16> to vector<16x8xbf16>
    %62 = vector.extract_strided_slice %12 {offsets = [0, 24], sizes = [16, 8], strides = [1, 1]} : vector<16x64xbf16> to vector<16x8xbf16>
    %63 = vector.extract_strided_slice %12 {offsets = [0, 56], sizes = [16, 8], strides = [1, 1]} : vector<16x64xbf16> to vector<16x8xbf16>
    %cst_18 = arith.constant dense<0.000000e+00> : vector<16x16xf32>
    %64 = tpu.matmul %61, %62, %cst_18 {dimension_numbers = #tpu.dot_dimension_numbers<[1], [1], [0], [0], [0, 0, 1, 0], [], []>} : vector<16x8xbf16>, vector<16x8xbf16>, vector<16x16xf32> -> vector<16x16xf32>
    %cst_19 = arith.constant dense<0xFF800000> : vector<16xf32>
    %65 = vector.multi_reduction <maximumf>, %64, %cst_19 [1] : vector<16x16xf32> to vector<16xf32>
    %66 = vector.shape_cast %65 : vector<16xf32> to vector<16x1xf32>
    %67 = vector.broadcast %66 : vector<16x1xf32> to vector<16x16xf32>
    %68 = arith.subf %64, %67 : vector<16x16xf32>
    %69 = math.exp %68 : vector<16x16xf32>
    %cst_20 = arith.constant dense<0.000000e+00> : vector<16xf32>
    %70 = vector.multi_reduction <add>, %69, %cst_20 [1] : vector<16x16xf32> to vector<16xf32>
    %71 = vector.shape_cast %70 : vector<16xf32> to vector<16x1xf32>
    %72 = arith.truncf %69 : vector<16x16xf32> to vector<16x16xbf16>
    %cst_21 = arith.constant dense<0.000000e+00> : vector<16x8xf32>
    %73 = tpu.matmul %72, %63, %cst_21 {dimension_numbers = #tpu.dot_dimension_numbers<[1], [0], [0], [1], [0, 0, 1, 1], [], []>} : vector<16x16xbf16>, vector<16x8xbf16>, vector<16x8xf32> -> vector<16x8xf32>
    %74 = tpu.reciprocal %71 {approx = true} : vector<16x1xf32> -> vector<16x1xf32>
    %75 = vector.broadcast %74 : vector<16x1xf32> to vector<16x8xf32>
    %76 = arith.mulf %73, %75 : vector<16x8xf32>
    %77 = tpu.concatenate %28, %44, %60, %76 in 1 : vector<16x8xf32>, vector<16x8xf32>, vector<16x8xf32>, vector<16x8xf32> -> vector<16x32xf32>
    %78 = arith.truncf %77 : vector<16x32xf32> to vector<16x32xbf16>
    %c0_22 = arith.constant 0 : index
    %c0_23 = arith.constant 0 : index
    %79 = vector.load %arg5[%c0_22, %c0_23] : memref<32x32xbf16, #tpu.memory_space<vmem>>, vector<32x32xbf16>
    %cst_24 = arith.constant dense<0.000000e+00> : vector<16x32xf32>
    %80 = tpu.matmul %78, %79, %cst_24 {dimension_numbers = #tpu.dot_dimension_numbers<[1], [0], [0], [1], [0, 0, 1, 1], [], []>} : vector<16x32xbf16>, vector<32x32xbf16>, vector<16x32xf32> -> vector<16x32xf32>
    %c0_25 = arith.constant 0 : index
    %c0_26 = arith.constant 0 : index
    %81 = vector.load %arg6[%c0_25, %c0_26] : memref<1x32xf32, #tpu.memory_space<vmem>>, vector<1x32xf32>
    %82 = vector.broadcast %81 : vector<1x32xf32> to vector<16x32xf32>
    %83 = arith.addf %80, %82 : vector<16x32xf32>
    %c0_27 = arith.constant 0 : index
    %c0_28 = arith.constant 0 : index
    %c0_29 = arith.constant 0 : index
    %84 = vector.load %arg7[%c0_27, %c0_28, %c0_29] : memref<1x16x32xf32, #tpu.memory_space<vmem>>, vector<1x16x32xf32>
    %85 = vector.shape_cast %84 : vector<1x16x32xf32> to vector<16x32xf32>
    %86 = vector.shape_cast %83 : vector<16x32xf32> to vector<1x16x32xf32>
    tpu.vector_store %arg7[%c0_27, %c0_28, %c0_29], %86 {strides = array<i32>} : memref<1x16x32xf32, #tpu.memory_space<vmem>>, vector<1x16x32xf32>,
    return
  }
  func.func @transform_0(%arg0: i32, %arg1: i32) -> (i32, i32, i32) {
    %c0_i32 = arith.constant 0 : i32
    %c0_i32_0 = arith.constant 0 : i32
    %c0_i32_1 = arith.constant 0 : i32
    return %arg0, %c0_i32, %c0_i32_0 : i32, i32, i32
  }
  func.func @transform_1(%arg0: i32, %arg1: i32) -> (i32, i32) {
    %c0_i32 = arith.constant 0 : i32
    %c0_i32_0 = arith.constant 0 : i32
    %c0_i32_1 = arith.constant 0 : i32
    return %c0_i32, %c0_i32_0 : i32, i32
  }
  func.func @transform_2(%arg0: i32, %arg1: i32) -> (i32, i32) {
    %c0_i32 = arith.constant 0 : i32
    %c0_i32_0 = arith.constant 0 : i32
    %c0_i32_1 = arith.constant 0 : i32
    return %c0_i32, %c0_i32_0 : i32, i32
  }
  func.func @transform_3(%arg0: i32, %arg1: i32) -> (i32, i32) {
    %c0_i32 = arith.constant 0 : i32
    %c0_i32_0 = arith.constant 0 : i32
    %c0_i32_1 = arith.constant 0 : i32
    return %c0_i32, %c0_i32_0 : i32, i32
  }
  func.func @transform_4(%arg0: i32, %arg1: i32) -> (i32, i32) {
    %c0_i32 = arith.constant 0 : i32
    %c0_i32_0 = arith.constant 0 : i32
    %c0_i32_1 = arith.constant 0 : i32
    return %c0_i32, %c0_i32_0 : i32, i32
  }
  func.func @transform_5(%arg0: i32, %arg1: i32) -> (i32, i32, i32) {
    %c0_i32 = arith.constant 0 : i32
    %c0_i32_0 = arith.constant 0 : i32
    return %arg0, %arg1, %c0_i32 : i32, i32, i32
  }
}

</mosaic_0001>

<bundles_post_ra>
// kernel: tpu_custom_call.1
= control target key start
LH: loop header
LB: loop body
LE: loop exit
PB: predicated region body
PF: predicated region fallthrough
CT: control target
= control target key end

     0   :  { %s2028_s0 = inlined_call_operand.hbm [shape: f32[2,16,32], index: 0, kind: input, shape index: {}]   ;;  %s2029_s1 = inlined_call_operand.hbm [shape: bf16[32,32], index: 1, kind: input, shape index: {}]   ;;  %s2030_s2 = inlined_call_operand.hbm [shape: bf16[32,64], index: 2, kind: input, shape index: {}]   ;;  %s2031_s3 = inlined_call_operand.hbm [shape: bf16[32,32], index: 3, kind: input, shape index: {}]   ;;  %s2032_s4 = inlined_call_operand.vmem [shape: f32[1,32], index: 4, kind: input, shape index: {}]   ;;  %s2033_s5 = inlined_call_operand.hbm [shape: f32[2,16,32], index: 5, kind: output, shape index: {}]  }
   0x1   :  { %2038 = sst [smem:[#allocation16_spill]] %s2029_s1 }
   0x2   :  { %10 = vsyncpa [#allocation4], 0 }
   0x3   :  { %12 = vsyncpa [#allocation4 + $0x1], 0 }
   0x4   :  { %13 = vsyncpa [#allocation7], 0 }
   0x5   :  { %14 = vsyncpa [#allocation10], 0 }
   0x6   :  { %15 = vsyncpa [#allocation5], 0 }
   0x7   :  { %17 = vsyncpa [#allocation5 + $0x1], 0  ;;  %s1726_s18 = smov 0   ;;  %s1728_s19 = smov 0  }
   0x8   :  { %s1730_s20 = smov 0   ;;  %s1732_s21 = smov 0  }
   0x9   :  { %s1734_s22 = smov 0   ;;  %s1736_s23 = smov 0  }
   0xa LB: > { %s1171_s24 = sadd.s32 4294967295, %s1672_s23   ;;  %s1172_s25 = sadd.s32 4294967294, %s1672_s23   ;;  %s1672_s23 = sphi %s1736_s23, %s23_s23   ;;  %s1668_s22 = sphi %s1734_s22, %s2057_s22   ;;  %s1664_s21 = sphi %s1732_s21, %s2056_s21   ;;  %s1660_s20 = sphi %s1730_s20, %s2055_s20   ;;  %s1656_s19 = sphi %s1728_s19, %s2054_s19   ;;  %s1652_s18 = sphi %s1726_s18, %s2053_s18  }
   0xb   : > { %p55_p0 = scmp.ne.s32.totalorder %s1656_s19, %s1652_s18  ;;  %p1760_p1 = scmp.eq.s32.totalorder %s1171_s24, 0 }
   0xc   : > { %p1764_p2 = scmp.eq.s32.totalorder %s1171_s24, 1  ;;  %p171_p3 = scmp.eq.s32.totalorder %s1172_s25, 1 }
   0xd   : > { %s2039_s26 = scalar_select %p1760_p1, 1, 0 }
   0xe   : > { %p1770_p4 = por %p1760_p1, %p55_p0  ;;  %p1173_p5 = scmp.ge.s32.totalorder %s1672_s23, 1 }
   0xf   : > { %p1775_p6 = por %p171_p3, %p55_p0  ;;  %p178_p7 = scmp.lt.s32.totalorder %s1672_s23, 3 }
  0x10   : > { %s2041_s28 = scalar_select %p1770_p4, 1, 0 }
  0x11   : > { %s2042_s29 = scalar_select %p1775_p6, 1, 0 }
  0x12   : > { %p1780_p8 = pnand %p1173_p5, %p178_p7  ;;  %s1674_s6 = smov [#allocation6]  }
  0x13   : > { %s190_s7 = sshll.u32 %s1674_s6, 4  ;;  %s1675_s9 = smov [#allocation8]   ;;  %s191_s7 = int_to_ptr.vmem [resolvable:$true] %s190_s7 }
  0x14   : > { %s2043_s30 = scalar_select %p1780_p8, 1, 0 }
  0x15   : > { %p1330_p9 = pneg %p1780_p8  ;;  %s203_s10 = sshll.u32 %s1675_s9, 4  ;;  %s204_s10 = int_to_ptr.vmem [resolvable:$true] %s203_s10 }
  0x16   : > { %s1676_s11 = smov [#allocation9]   ;;  %s1489_s13 = scalar_lea.vmem %s191_s7, 256 }
  0x17   : > { %p1789_p11 = pnand %p1330_p9, %p1760_p1  ;;  %s216_s12 = sshll.u32 %s1676_s11, 4  ;;  %s217_s12 = int_to_ptr.vmem [resolvable:$true] %s216_s12 }
  0x18   : > { %p1490_p13 = scmp.ne.s32.totalorder %s191_s7, %s1489_s13  ;;  %p1497_p5 = scmp.lt.s32.totalorder %s191_s7, %s191_s7 }
  0x19   : > { %p1480_p12 = pneg %p1789_p11  ;;  %p1498_p7 = scmp.lt.s32.totalorder %s1489_s13, %s1489_s13 }
  0x1b   : > { %p1492_p0 = pnand %p1490_p13, %p1480_p12  ;;  %p1499_p9 = por %p1498_p7, %p1497_p5 }
  0x1d   : > { %p1493_p3 = pneg %p1492_p0 }
  0x1f   : > { %p1500_p10 = pnand %p1499_p9, %p1493_p3 }
  0x21   : > { %1503 = shalt.err (!%p1500_p10)
}
  0x22   : > { %s1677_s14 = smov 64   ;;  %s1678_s15 = smov 4  }
  0x23   : > { %s2045_s1 = sld [smem:[#allocation16_spill]]  ;;  %s1515_s24 = scalar_lea.vmem %s204_s10, 256 }
  0x24   : > { %p1516_p6 = scmp.ne.s32.totalorder %s204_s10, %s1515_s24  ;;  %p1523_p1 = scmp.lt.s32.totalorder %s204_s10, %s204_s10 }
  0x25   : > { %p1524_p4 = scmp.lt.s32.totalorder %s1515_s24, %s1515_s24 }
  0x26   : > { %p1518_p13 = pnand %p1516_p6, %p1480_p12 }
  0x27   : > { %p1525_p5 = por %p1524_p4, %p1523_p1 }
  0x28   : > { %p1519_p0 = pneg %p1518_p13 }
  0x29   : > { %1333 = dma.hbm_to_vmem [thread:$0]  (!%p1789_p11), %s2045_s1, 256, %s191_s7, [#allocation7], %s1677_s14, %s1677_s14, %s1678_s15  }
  0x2a   : > { %p1526_p3 = pnand %p1525_p5, %p1519_p0 }
  0x2c   : > { %1529 = shalt.err (!%p1526_p3)
}
  0x2d   : > { %1336 = dma.hbm_to_vmem [thread:$0]  (!%p1789_p11), %s2030_s2, 256, %s204_s10, [#allocation7], %s1677_s14, %s1677_s14, %s1678_s15  }
  0x2e   : > { %s1541_s7 = scalar_lea.vmem %s217_s12, 256  ;;  %p1549_p9 = scmp.lt.s32.totalorder %s217_s12, %s217_s12 }
  0x2f   : > { %p1542_p10 = scmp.ne.s32.totalorder %s217_s12, %s1541_s7  ;;  %p1550_p13 = scmp.lt.s32.totalorder %s1541_s7, %s1541_s7 }
  0x31   : > { %p1544_p7 = pnand %p1542_p10, %p1480_p12  ;;  %p1551_p8 = por %p1550_p13, %p1549_p9 }
  0x33   : > { %p1545_p6 = pneg %p1544_p7 }
  0x35   : > { %p1552_p1 = pnand %p1551_p8, %p1545_p6 }
  0x37   : > { %1555 = shalt.err (!%p1552_p1)
}
  0x38   : > { %1339 = dma.hbm_to_vmem [thread:$0]  (!%p1789_p11), %s2031_s3, 256, %s217_s12, [#allocation10], %s1677_s14, %s1677_s14, %s1678_s15  }
  0x39   : > { %s42_s10 = sadd.s32 1, %s1660_s20  ;;  %s35_s13 = sadd.s32 1, %s1668_s22 }
  0x3a   : > { %p49_p4 = scmp.ne.s32.totalorder %s1660_s20, %s1656_s19  ;;  %p37_p8 = scmp.ge.s32.totalorder %s35_s13, 2 }
  0x3b   : > { %p50_p12 = scmp.eq.s32.totalorder %s1672_s23, 0  ;;  %p1351_p5 = scmp.lt.s32.totalorder %s1672_s23, 2 }
  0x3c   : > { %p1826_p0 = por %p1764_p2, %p49_p4  ;;  %s2059_s13 = smov (%p37_p8, %s35_s13), 0 }
  0x3d   : > { %p51_p3 = por %p50_p12, %p49_p4  ;;  %s233_s16 = sand.u32 1, %s1660_s20  }
  0x3e   : > { %s39_s17 = ssub.s32 %s1668_s22, %s2059_s13  ;;  %s1178_s12 = sshll.u32 %s233_s16, 4 }
  0x3f   : > { %p40_p10 = scmp.eq.s32.totalorder %s39_s17, 0  ;;  %s1213_s14 = sshll.u32 %s1668_s22, 8 }
  0x40   : > { %s243_s27 = scalar_lea.hbm %s2028_s0, %s1213_s14  ;;  %s237_s6 = scalar_lea.vmem [#allocation3], %s1178_s12 }
  0x41   : > { %s1838_s15 = scalar_select %p40_p10, %s1660_s20, %s42_s10  }
  0x42   : > { %s244_s7 = sshll.u32 %s237_s6, 4  ;;  %p1845_p2 = pnand %p1351_p5, %p51_p3  ;;  %s245_s7 = int_to_ptr.vmem [resolvable:$true] %s244_s7 }
  0x43   : > { %s234_s11 = scalar_lea.sflag [#allocation4], %s233_s16  ;;  %s1569_s17 = scalar_lea.vmem %s245_s7, 256 }
  0x44   : > { %p1558_p11 = pneg %p1845_p2  ;;  %p1570_p7 = scmp.ne.s32.totalorder %s245_s7, %s1569_s17 }
  0x45   : > { %s1679_s10 = smov [#allocation3]  }
  0x46   : > { %p1572_p6 = pnand %p1570_p7, %p1558_p11  ;;  %s1574_s1 = sshll.u32 %s1679_s10, 4  ;;  %s1575_s1 = int_to_ptr.vmem [resolvable:$false] %s1574_s1 }
  0x47   : > { %s1576_s14 = scalar_lea.vmem %s1575_s1, 512  ;;  %p1577_p13 = scmp.lt.s32.totalorder %s245_s7, %s1575_s1 }
  0x48   : > { %p1573_p9 = pneg %p1572_p6  ;;  %p1578_p1 = scmp.lt.s32.totalorder %s1576_s14, %s1569_s17 }
  0x4a   : > { %p1579_p4 = por %p1578_p1, %p1577_p13 }
  0x4c   : > { %p1580_p8 = pnand %p1579_p4, %p1573_p9 }
  0x4e   : > { %1583 = shalt.err (!%p1580_p8)
}
  0x4f   : > { %s1680_s12 = smov 128   ;;  %s1681_s24 = smov 8  }
  0x50   : > { %1343 = dma.hbm_to_vmem [thread:$0]  (!%p1845_p2), %s243_s27, 256, %s245_s7, %s234_s11, %s1680_s12, %s1680_s12, %s1681_s24  }
  0x51   : > { %p2048_p12 = scmp.ne.s32.totalorder %s2043_s30, 0 }
  0x52   : > { %s1856_s16 = sand.u32 (!%p2048_p12), 1, %s1656_s19   ;;  %p2049_p5 = scmp.ne.s32.totalorder (!%p2048_p12), %s2041_s28, 0 }
  0x53   : > { %256 = sbr.rel (%p2048_p12) target bundleno = 1343 (0x53f), region = 40  ;;  %s1182_s1 = sshll.u32 (!%p2048_p12), %s1856_s16, 4 }
  0x54   : > { %s259_s25 = scalar_lea.sflag (!%p2048_p12), [#allocation4], %s1856_s16  ;;  %s262_s6 = scalar_lea.vmem (!%p2048_p12), [#allocation3], %s1182_s1 }
  0x58   : > { %1635 = dma.done.wait (%p2049_p5), %s259_s25, 256  }
  0x59   : > { %1637 = vsyncadd (%p2049_p5), %s259_s25, 4294967040  ;;  %p2050_p3 = scmp.ne.s32.totalorder %s2039_s26, 0 }
  0x5b   : > { %1639 = dma.done.wait (%p2050_p3), [#allocation7], 512  }
  0x5c   : > { %1641 = vsyncadd (%p2050_p3), [#allocation7], 4294966784 }
  0x5d   : > { %1643 = dma.done.wait (%p2050_p3), [#allocation10], 256  }
  0x5e   : > { %1645 = vsyncadd (%p2050_p3), [#allocation10], 4294967040  ;;  %v1682_v0 = vmov 0.0   ;;  %vm1683_vm0 = vmmov 0   ;;  %v1439_v1 = vld [vmem:[#allocation8 + $0x8] sm:$0xff]   ;;  %v1440_v2 = vld [vmem:[#allocation8] sm:$0xff]  }
  0x5f   : > { %1242 = vmatprep.subr.bf16.mxu0 %v1682_v0  ;;  %1246 = vmatprep.mubr.msk.bf16.mxu0 %vm1683_vm0, %v1682_v0  ;;  %v307_v3 = vld [vmem:[%s262_s6] sm:$0xff]  ;;  %v308_v4 = vld [vmem:[%s262_s6 + $0x8] sm:$0xff]  ;;  %vm326_vm1 = vcmask 261120   ;;  %vm379_vm2 = vcmask 519168   ;;  %vm456_vm3 = vcmask 64512   ;;  %s1684_s26 = smov 112  }
  0x60   : > { %1250 = vmatprep.subr.bf16.mxu1 %v1682_v0  ;;  %1254 = vmatprep.mubr.msk.bf16.mxu1 %vm1683_vm0, %v1682_v0  ;;  %v1441_v5 = vld [vmem:[#allocation6 + $0x8] sm:$0xff]   ;;  %v1442_v6 = vld [vmem:[#allocation6] sm:$0xff]   ;;  %v309_v7 = vpack.c.bf16 %v308_v4, %v307_v3  ;;  %s1685_s28 = smov 120   ;;  %s1686_s30 = smov 104   ;;  %vm504_vm4 = vcmask 130048   ;;  %vm967_vm5 = vcmask 195584  }
  0x61   : > { %1243 = vmatpush3.bf16.msra.mxu0 %v1439_v1  ;;  %1251 = vmatpush3.bf16.msra.mxu1 %v1441_v5  ;;  %s1687_s27 = smov 96   ;;  %s1688_s7 = smov 80  }
  0x62   : > { %1244 = vmatprep.subr.bf16.mxu0 %v1682_v0  ;;  %1252 = vmatprep.subr.bf16.mxu1 %v1682_v0  ;;  %s1689_s9 = smov 72   ;;  %s1690_s11 = smov 88  }
  0x63   : > { %s1691_s17 = smov 8   ;;  %s1692_s10 = smov 16  }
  0x64   : > { %s1693_s14 = smov 24   ;;  %s300_s25 = scalar_lea.vmem [#allocation11], %s1182_s1 }
  0x65   : > { %1245 = vmatpush3.bf16.msra.mxu0 %v1440_v2  ;;  %1253 = vmatpush3.bf16.msra.mxu1 %v1442_v6  ;;  %s1056_s6 = sshll.u32 %s300_s25, 4  ;;  %s1041_s1 = scalar_lea.sflag [#allocation5], %s1856_s16  ;;  %s1973_s6 = int_to_ptr.vmem [resolvable:$true] %s1056_s6 }
  0x66   : > { %1258 = vmatprep.subr.bf16.mxu0 %v1682_v0  ;;  %1264 = vmatprep.subr.bf16.mxu1 %v1682_v0 }
  0x68   : > { %1247 = vmatmul.mubr.msk.bf16.vlgmr.msra.gmra.mxu0 %vm326_vm1, %v309_v7  ;;  %1255 = vmatmul.mubr.msk.bf16.vlgmr.msra.gmra.mxu1 %vm326_vm1, %v309_v7 }
  0x69   : > { %1260 = vmatprep.mubr.msk.bf16.mxu0 %vm1683_vm0, %v1682_v0  ;;  %1266 = vmatprep.mubr.msk.bf16.mxu1 %vm1683_vm0, %v1682_v0 }
 0x128   : > { %v364_v8 = vpop.f32.mrf.mxu0  ;;  %v441_v11 = vpop.f32.mrf.mxu1 }
 0x129   : > { %v1214_v9 = vpack.c.bf16 %v364_v8, %v364_v8 }
 0x12a   : > { %v1248_v10 = vpop.f32.mrf.mxu0  ;;  %v1256_v14 = vpop.f32.mrf.mxu1 }
 0x12b   : > { %380 = vst.msk [vmem:[#allocation2] sm:$0xf] %vm379_vm2, %v1214_v9 }
 0x12c   : > { %v367_v12 = vpop.f32.mrf.mxu0  ;;  %v444_v16 = vpop.f32.mrf.mxu1 }
 0x12d   : > { %v1215_v13 = vpack.c.bf16 %v367_v12, %v367_v12  ;;  %v448_v19 = vpack.c.bf16 %v444_v16, %v441_v11 }
 0x12e   : > { %v1249_v15 = vpop.f32.mrf.mxu0  ;;  %v1257_v17 = vpop.f32.mrf.mxu1 }
 0x12f   : > { %381 = vst.msk [vmem:[#allocation2 + $0x4] sm:$0xf] %vm379_vm2, %v1215_v13 }
 0x136   : > { %v1890_v18 = vld [vmem:[#allocation2] sm:$0xff]  }
 0x137   : > { %699 = vrot.lane.b32.xlu1 %v1890_v18, %s1684_s26  ;;  %578 = vrot.lane.b32.xlu0 %v1890_v18, %s1685_s28  ;;  %v461_v20 = vsel %vm456_vm3, %v1890_v18, 0 }
 0x138   : > { %1259 = vmatpush3.bf16.xpose.msra.mxu0 %v461_v20 }
 0x139   : > { %1270 = vmatprep.subr.bf16.mxu0 %v1682_v0 }
 0x13b   : > { %697 = vrot.lane.b32.xlu1 %v448_v19, %s1684_s26  ;;  %576 = vrot.lane.b32.xlu0 %v448_v19, %s1685_s28  ;;  %s1216_s26 = sshll.u32 %s1664_s21, 8  ;;  %s1694_s21 = smov [#allocation11]  }
 0x13f   : > { %818 = vrot.lane.b32.xlu1 %v448_v19, %s1686_s30  ;;  %820 = vrot.lane.b32.xlu0 %v1890_v18, %s1686_s30 }
 0x140   : > { %1261 = vmatmul.mubr.msk.bf16.vlgmr.msra.gmra.mxu0 %vm456_vm3, %v448_v19 }
 0x141   : > { %1272 = vmatprep.mubr.msk.bf16.mxu0 %vm1683_vm0, %v1682_v0 }
 0x1a9   : > { %v579_v21 = vpop.permute.xlu0 %578  ;;  %v700_v23 = vpop.permute.xlu1 %699 }
 0x1aa   : > { %v584_v22 = vsel %vm456_vm3, %v579_v21, 0  ;;  %v705_v25 = vsel %vm456_vm3, %v700_v23, 0 }
 0x1ab   : > { %1271 = vmatpush3.bf16.xpose.msra.mxu0 %v584_v22 }
 0x1ac   : > { %1282 = vmatprep.subr.bf16.mxu0 %v1682_v0 }
 0x1ad   : > { %v577_v24 = vpop.permute.xlu0 %576  ;;  %v698_v27 = vpop.permute.xlu1 %697 }
 0x1b1   : > { %v821_v26 = vpop.permute.xlu0 %820  ;;  %v819_v29 = vpop.permute.xlu1 %818 }
 0x1b2   : > { %1273 = vmatmul.mubr.msk.bf16.vlgmr.msra.gmra.mxu0 %vm456_vm3, %v577_v24  ;;  %v826_v28 = vsel %vm456_vm3, %v821_v26, 0 }
 0x1b3   : > { %1283 = vmatpush3.bf16.xpose.msra.mxu0 %v705_v25  ;;  %1284 = vmatprep.mubr.msk.bf16.mxu0 %vm1683_vm0, %v1682_v0 }
 0x1b4   : > { %1294 = vmatprep.subr.bf16.mxu0 %v1682_v0 }
 0x1ba   : > { %1285 = vmatmul.mubr.msk.bf16.vlgmr.msra.gmra.mxu0 %vm456_vm3, %v698_v27 }
 0x1bb   : > { %1295 = vmatpush3.bf16.xpose.msra.mxu0 %v826_v28  ;;  %1296 = vmatprep.mubr.msk.bf16.mxu0 %vm1683_vm0, %v1682_v0 }
 0x1bc   : > { %1306 = vmatprep.subr.bf16.mxu0 %v1682_v0 }
 0x1c2   : > { %1297 = vmatmul.mubr.msk.bf16.vlgmr.msra.gmra.mxu0 %vm456_vm3, %v819_v29 }
 0x1c3   : > { %1310 = vmatprep.mubr.msk.bf16.mxu0 %vm1683_vm0, %v1682_v0 }
 0x200   : > { %v497_v30 = vpop.f32.mrf.mxu0 }
 0x201   : > { %v505_v31 = vsel %vm504_vm4, %v497_v30, -inf }
 0x202   : > { %506 = vmax.xlane.f32.xlu0 %v505_v31  ;;  %v1262_v32 = vpop.f32.mrf.mxu0 }
 0x204   : > { %v500_v33 = vpop.f32.mrf.mxu0 }
 0x205   : > { %v508_v34 = vsel %vm504_vm4, %v500_v33, -inf }
 0x206   : > { %509 = vmax.xlane.f32.xlu1 %v508_v34  ;;  %v1263_v35 = vpop.f32.mrf.mxu0 }
 0x217   : > { %524 = vrot.lane.b32.xlu1 %v1890_v18, %s1687_s27  ;;  %s1978_s27 = scalar_lea.hbm %s2033_s5, %s1216_s26 }
 0x272   : > { %v620_v36 = vpop.f32.mrf.mxu0 }
 0x273   : > { %v627_v37 = vsel %vm504_vm4, %v620_v36, -inf }
 0x274   : > { %628 = vmax.xlane.f32.xlu0 %v627_v37  ;;  %v1274_v38 = vpop.f32.mrf.mxu0 }
 0x276   : > { %v623_v39 = vpop.f32.mrf.mxu0 }
 0x277   : > { %v630_v40 = vsel %vm504_vm4, %v623_v39, -inf }
 0x278   : > { %631 = vmax.xlane.f32.xlu0 %v630_v40  ;;  %v1275_v41 = vpop.f32.mrf.mxu0 }
 0x27a   : > { %v741_v42 = vpop.f32.mrf.mxu0 }
 0x27b   : > { %v748_v43 = vsel %vm504_vm4, %v741_v42, -inf }
 0x27c   : > { %749 = vmax.xlane.f32.xlu1 %v748_v43  ;;  %v1286_v44 = vpop.f32.mrf.mxu0 }
 0x27e   : > { %v744_v45 = vpop.f32.mrf.mxu0 }
 0x27f   : > { %v751_v46 = vsel %vm504_vm4, %v744_v45, -inf }
 0x280   : > { %752 = vmax.xlane.f32.xlu0 %v751_v46  ;;  %v1287_v47 = vpop.f32.mrf.mxu0 }
 0x282   : > { %v862_v48 = vpop.f32.mrf.mxu0 }
 0x283   : > { %v869_v49 = vsel %vm504_vm4, %v862_v48, -inf }
 0x284   : > { %870 = vmax.xlane.f32.xlu1 %v869_v49  ;;  %v1298_v50 = vpop.f32.mrf.mxu0 }
 0x286   : > { %v865_v51 = vpop.f32.mrf.mxu0 }
 0x287   : > { %v872_v52 = vsel %vm504_vm4, %v865_v51, -inf }
 0x288   : > { %873 = vmax.xlane.f32.xlu0 %v872_v52  ;;  %v1299_v53 = vpop.f32.mrf.mxu0 }
 0x28b   : > { %v507_v54 = vpop.xlane.xlu0 %506 }
 0x28c   : > { %v511_v55 = vsub.f32 %v497_v30, %v507_v54 }
 0x28e   : > { %v513_v56 = vmul.f32 1.442695, %v511_v55 }
 0x28f   : > { %v510_v57 = vpop.xlane.xlu1 %509 }
 0x290   : > { %v512_v58 = vsub.f32 %v500_v33, %v510_v57  ;;  %1446 = vpow2.f32 %v513_v56  ;;  %v1444_v57 = vld [vmem:[#allocation9 + $0x8] sm:$0xff]  }
 0x291   : > { %1307 = vmatpush3.bf16.msra.mxu0 %v1444_v57 }
 0x292   : > { %v515_v59 = vmul.f32 1.442695, %v512_v58  ;;  %1308 = vmatprep.subr.bf16.mxu0 %v1682_v0 }
 0x293   : > { %v525_v60 = vpop.permute.xlu1 %524 }
 0x294   : > { %1448 = vpow2.f32 %v515_v59  ;;  %1265 = vmatpush3.bf16.msra.mxu1 %v525_v60 }
 0x295   : > { %767 = vrot.lane.b32.xlu1 %v1890_v18, %s1688_s7  ;;  %1276 = vmatprep.subr.bf16.mxu1 %v1682_v0  ;;  %s1584_s7 = scalar_lea.vmem %s1973_s6, 256 }
 0x296   : > { %p1585_p10 = scmp.ne.s32.totalorder %s1973_s6, %s1584_s7 }
 0x298   : > { %p1586_p2 = pnand %p1585_p10, %p1826_p0 }
 0x299   : > { %888 = vrot.lane.b32.xlu1 %v1890_v18, %s1689_s9  ;;  %s1588_s9 = sshll.u32 %s1694_s21, 4  ;;  %s1589_s9 = int_to_ptr.vmem [resolvable:$false] %s1588_s9 }
 0x29a   : > { %p1587_p11 = pneg %p1586_p2  ;;  %p1591_p7 = scmp.lt.s32.totalorder %s1973_s6, %s1589_s9 }
 0x29d   : > { %v1447_v61 = vpop.eup %1446 }
 0x29e   : > { %646 = vrot.lane.b32.xlu0 %v1890_v18, %s1690_s11  ;;  %v517_v35 = vsel %vm504_vm4, %v1447_v61, 0.0  ;;  %s1590_s11 = scalar_lea.vmem %s1589_s9, 512 }
 0x29f   : > { %p1592_p6 = scmp.lt.s32.totalorder %s1590_s11, %s1584_s7 }
 0x2a1   : > { %v1929_v62 = vpop.eup %1448  ;;  %p1593_p9 = por %p1592_p6, %p1591_p7 }
 0x2a2   : > { %v523_v63 = vpack.c.bf16 %v1929_v62, %v1447_v61  ;;  %v520_v38 = vsel %vm504_vm4, %v1929_v62, 0.0 }
 0x2a3   : > { %p1594_p13 = pnand %p1593_p9, %p1587_p11 }
 0x2a4   : > { %1267 = vmatmul.mubr.msk.bf16.vlgmr.msra.gmra.mxu1 %vm504_vm4, %v523_v63 }
 0x2a5   : > { %1278 = vmatprep.mubr.msk.bf16.mxu1 %vm1683_vm0, %v1682_v0 }
 0x2fd   : > { %v629_v1 = vpop.xlane.xlu0 %628 }
 0x2fe   : > { %v633_v2 = vsub.f32 %v620_v36, %v629_v1 }
 0x300   : > { %v635_v3 = vmul.f32 1.442695, %v633_v2 }
 0x301   : > { %v632_v4 = vpop.xlane.xlu0 %631 }
 0x302   : > { %1450 = vpow2.f32 %v635_v3  ;;  %v634_v5 = vsub.f32 %v623_v39, %v632_v4  ;;  %v1445_v3 = vld [vmem:[#allocation9] sm:$0xff]  }
 0x303   : > { %1309 = vmatpush3.bf16.msra.mxu0 %v1445_v3 }
 0x304   : > { %v637_v6 = vmul.f32 1.442695, %v634_v5 }
 0x305   : > { %v750_v7 = vpop.xlane.xlu1 %749 }
 0x306   : > { %1452 = vpow2.f32 %v637_v6  ;;  %v754_v8 = vsub.f32 %v741_v42, %v750_v7 }
 0x308   : > { %v756_v9 = vmul.f32 1.442695, %v754_v8 }
 0x309   : > { %v753_v10 = vpop.xlane.xlu0 %752 }
 0x30a   : > { %1454 = vpow2.f32 %v756_v9  ;;  %v755_v11 = vsub.f32 %v744_v45, %v753_v10 }
 0x30c   : > { %v758_v12 = vmul.f32 1.442695, %v755_v11 }
 0x30d   : > { %v871_v13 = vpop.xlane.xlu1 %870 }
 0x30e   : > { %1456 = vpow2.f32 %v758_v12  ;;  %v875_v14 = vsub.f32 %v862_v48, %v871_v13 }
 0x30f   : > { %v1451_v15 = vpop.eup %1450 }
 0x310   : > { %v877_v16 = vmul.f32 1.442695, %v875_v14  ;;  %v639_v17 = vsel %vm504_vm4, %v1451_v15, 0.0 }
 0x311   : > { %640 = vadd.xlane.f32.xlu0 %v639_v17  ;;  %v874_v18 = vpop.xlane.xlu0 %873  ;;  %v768_v27 = vpop.permute.xlu1 %767 }
 0x312   : > { %1458 = vpow2.f32 %v877_v16  ;;  %v876_v19 = vsub.f32 %v865_v51, %v874_v18 }
 0x313   : > { %v1453_v20 = vpop.eup %1452 }
 0x314   : > { %v879_v21 = vmul.f32 1.442695, %v876_v19  ;;  %v642_v22 = vsel %vm504_vm4, %v1453_v20, 0.0  ;;  %v645_v25 = vpack.c.bf16 %v1453_v20, %v1451_v15 }
 0x315   : > { %643 = vadd.xlane.f32.xlu1 %v642_v22  ;;  %v647_v23 = vpop.permute.xlu0 %646  ;;  %v889_v33 = vpop.permute.xlu1 %888 }
 0x316   : > { %1460 = vpow2.f32 %v879_v21  ;;  %1277 = vmatpush3.bf16.msra.mxu1 %v647_v23 }
 0x317   : > { %v1455_v24 = vpop.eup %1454  ;;  %1288 = vmatprep.subr.bf16.mxu1 %v1682_v0 }
 0x318   : > { %v760_v26 = vsel %vm504_vm4, %v1455_v24, 0.0 }
 0x319   : > { %761 = vadd.xlane.f32.xlu0 %v760_v26  ;;  %1279 = vmatmul.mubr.msk.bf16.vlgmr.msra.gmra.mxu1 %vm504_vm4, %v645_v25 }
 0x31a   : > { %1289 = vmatpush3.bf16.msra.mxu1 %v768_v27  ;;  %1290 = vmatprep.mubr.msk.bf16.mxu1 %vm1683_vm0, %v1682_v0 }
 0x31b   : > { %v1457_v28 = vpop.eup %1456  ;;  %1300 = vmatprep.subr.bf16.mxu1 %v1682_v0 }
 0x31c   : > { %v763_v29 = vsel %vm504_vm4, %v1457_v28, 0.0  ;;  %v766_v31 = vpack.c.bf16 %v1457_v28, %v1455_v24 }
 0x31d   : > { %764 = vadd.xlane.f32.xlu0 %v763_v29 }
 0x31f   : > { %v1459_v30 = vpop.eup %1458 }
 0x320   : > { %v881_v32 = vsel %vm504_vm4, %v1459_v30, 0.0 }
 0x321   : > { %882 = vadd.xlane.f32.xlu1 %v881_v32  ;;  %1291 = vmatmul.mubr.msk.bf16.vlgmr.msra.gmra.mxu1 %vm504_vm4, %v766_v31 }
 0x322   : > { %1301 = vmatpush3.bf16.msra.mxu1 %v889_v33  ;;  %1302 = vmatprep.mubr.msk.bf16.mxu1 %vm1683_vm0, %v1682_v0 }
 0x323   : > { %v1461_v34 = vpop.eup %1460 }
 0x324   : > { %v884_v36 = vsel %vm504_vm4, %v1461_v34, 0.0  ;;  %v887_v37 = vpack.c.bf16 %v1461_v34, %v1459_v30 }
 0x325   : > { %518 = vadd.xlane.f32.xlu1 %v517_v35  ;;  %885 = vadd.xlane.f32.xlu0 %v884_v36  ;;  %v1204_v36 = vld [vmem:[%s2032_s4] ss:$0 sm:$0xff] }
 0x329   : > { %521 = vadd.xlane.f32.xlu0 %v520_v38  ;;  %1303 = vmatmul.mubr.msk.bf16.vlgmr.msra.gmra.mxu1 %vm504_vm4, %v887_v37 }
 0x364   : > { %v1953_v39 = vpop.f32.mrf.mxu1 }
 0x366   : > { %v1268_v40 = vpop.f32.mrf.mxu1 }
 0x368   : > { %v1955_v41 = vpop.f32.mrf.mxu1 }
 0x36a   : > { %v1269_v42 = vpop.f32.mrf.mxu1 }
 0x39a   : > { %v641_v43 = vpop.xlane.xlu0 %640 }
 0x39b   : > { %1462 = vrcp.f32 %v641_v43 }
 0x39e   : > { %v644_v44 = vpop.xlane.xlu1 %643 }
 0x39f   : > { %1464 = vrcp.f32 %v644_v44 }
 0x3a2   : > { %v762_v45 = vpop.xlane.xlu0 %761 }
 0x3a3   : > { %1466 = vrcp.f32 %v762_v45 }
 0x3a6   : > { %v765_v46 = vpop.xlane.xlu0 %764 }
 0x3a7   : > { %1468 = vrcp.f32 %v765_v46 }
 0x3a8   : > { %v1463_v49 = vpop.eup %1462 }
 0x3aa   : > { %v883_v50 = vpop.xlane.xlu1 %882 }
 0x3ab   : > { %1470 = vrcp.f32 %v883_v50 }
 0x3ac   : > { %v1465_v51 = vpop.eup %1464 }
 0x3ae   : > { %v886_v52 = vpop.xlane.xlu0 %885  ;;  %v519_v14 = vpop.xlane.xlu1 %518 }
 0x3af   : > { %1472 = vrcp.f32 %v886_v52 }
 0x3b0   : > { %v1467_v61 = vpop.eup %1466  ;;  %1474 = vrcp.f32 %v519_v14 }
 0x3b2   : > { %v522_v15 = vpop.xlane.xlu0 %521 }
 0x3b3   : > { %1476 = vrcp.f32 %v522_v15 }
 0x3b4   : > { %v1469_v62 = vpop.eup %1468 }
 0x3b8   : > { %v1471_v8 = vpop.eup %1470 }
 0x3bc   : > { %v1473_v9 = vpop.eup %1472 }
 0x3bd   : > { %v1475_v17 = vpop.eup %1474 }
 0x3be   : > { %v573_v24 = vmul.f32 %v1475_v17, %v1953_v39 }
 0x3c0   : > { %v1477_v19 = vpop.eup %1476 }
 0x3c1   : > { %v574_v25 = vmul.f32 %v1477_v19, %v1955_v41 }
 0x3d9   : > { %v686_v47 = vpop.f32.mrf.mxu1 }
 0x3da   : > { %v695_v54 = vmul.f32 %v1463_v49, %v686_v47 }
 0x3db   : > { %v1280_v48 = vpop.f32.mrf.mxu1 }
 0x3dd   : > { %v689_v53 = vpop.f32.mrf.mxu1 }
 0x3de   : > { %v696_v55 = vmul.f32 %v1465_v51, %v689_v53 }
 0x3df   : > { %v1281_v56 = vpop.f32.mrf.mxu1 }
 0x3e0   : > { %v1424_v58 = vpack.i.bf16 %v696_v55, %v695_v54 }
 0x3e1   : > { %v807_v59 = vpop.f32.mrf.mxu1 }
 0x3e2   : > { %1425 = vrot.lane.b32.xlu1 %v1424_v58, %s1691_s17  ;;  %v816_v1 = vmul.f32 %v1467_v61, %v807_v59 }
 0x3e3   : > { %v1292_v60 = vpop.f32.mrf.mxu1 }
 0x3e5   : > { %v810_v63 = vpop.f32.mrf.mxu1 }
 0x3e6   : > { %v817_v2 = vmul.f32 %v1469_v62, %v810_v63 }
 0x3e7   : > { %v1293_v4 = vpop.f32.mrf.mxu1 }
 0x3e8   : > { %v1429_v5 = vpack.i.bf16 %v817_v2, %v816_v1 }
 0x3e9   : > { %v928_v6 = vpop.f32.mrf.mxu1 }
 0x3ea   : > { %1430 = vrot.lane.b32.xlu0 %v1429_v5, %s1692_s10  ;;  %v937_v11 = vmul.f32 %v1471_v8, %v928_v6 }
 0x3eb   : > { %v1304_v7 = vpop.f32.mrf.mxu1 }
 0x3ed   : > { %v931_v10 = vpop.f32.mrf.mxu1 }
 0x3ee   : > { %v938_v12 = vmul.f32 %v1473_v9, %v931_v10 }
 0x3ef   : > { %v1305_v0 = vpop.f32.mrf.mxu1 }
 0x3f0   : > { %v1434_v13 = vpack.i.bf16 %v938_v12, %v937_v11 }
 0x3f2   : > { %1435 = vrot.lane.b32.xlu1 %v1434_v13, %s1693_s14 }
 0x454   : > { %v1426_v16 = vpop.permute.xlu1 %1425 }
 0x455   : > { %v1428_v20 = vunpack.i.h.bf16 %v1426_v16  ;;  %v1427_v21 = vunpack.i.l.bf16 %v1426_v16 }
 0x457   : > { %v963_v27 = vsel %vm456_vm3, %v573_v24, %v1427_v21  ;;  %v964_v28 = vsel %vm456_vm3, %v574_v25, %v1428_v20 }
 0x45c   : > { %v1431_v18 = vpop.permute.xlu0 %1430 }
 0x45d   : > { %v1433_v22 = vunpack.i.h.bf16 %v1431_v18  ;;  %v1432_v23 = vunpack.i.l.bf16 %v1431_v18 }
 0x45f   : > { %v966_v31 = vsel %vm504_vm4, %v964_v28, %v1433_v22  ;;  %v965_v32 = vsel %vm504_vm4, %v963_v27, %v1432_v23 }
 0x464   : > { %v1436_v26 = vpop.permute.xlu1 %1435 }
 0x465   : > { %v1438_v29 = vunpack.i.h.bf16 %v1436_v26  ;;  %v1437_v30 = vunpack.i.l.bf16 %v1436_v26 }
 0x467   : > { %v968_v33 = vsel %vm967_vm5, %v965_v32, %v1437_v30  ;;  %v969_v34 = vsel %vm967_vm5, %v966_v31, %v1438_v29 }
 0x468   : > { %v970_v35 = vpack.c.bf16 %v969_v34, %v968_v33 }
 0x46a   : > { %1311 = vmatmul.mubr.msk.bf16.vlgmr.msra.gmra.mxu0 %vm326_vm1, %v970_v35 }
 0x52a   : > { %v1031_v37 = vpop.f32.mrf.mxu0 }
 0x52b   : > { %v1032_v38 = vadd.f32 %v1204_v36, %v1031_v37 }
 0x52c   : > { %v1312_v39 = vpop.f32.mrf.mxu0 }
 0x52d   : > { %1038 = vst.msk [vmem:[%s300_s25] sm:$0xff] %vm326_vm1, %v1032_v38 }
 0x52e   : > { %v1034_v40 = vpop.f32.mrf.mxu0 }
 0x52f   : > { %v1035_v41 = vadd.f32 %v1204_v36, %v1034_v40 }
 0x530   : > { %v1313_v42 = vpop.f32.mrf.mxu0 }
 0x531   : > { %1039 = vst.msk [vmem:[%s300_s25 + $0x8] sm:$0xff] %vm326_vm1, %v1035_v41 }
 0x532   : > { %1597 = shalt.err (!%p1594_p13)
}
 0x533   : > { %s1598_s10 = scalar_lea.hbm %s1978_s27, 256  ;;  %s1602_s24 = scalar_lea.hbm %s2033_s5, 512 }
 0x534   : > { %p1599_p1 = scmp.ne.s32.totalorder %s1978_s27, %s1598_s10  ;;  %p1603_p12 = scmp.lt.s32.totalorder %s1978_s27, %s2033_s5 }
 0x535   : > { %p1604_p5 = scmp.lt.s32.totalorder %s1602_s24, %s1598_s10 }
 0x536   : > { %p1600_p4 = pnand %p1599_p1, %p1826_p0 }
 0x537   : > { %p1605_p3 = por %p1604_p5, %p1603_p12 }
 0x538   : > { %p1601_p8 = pneg %p1600_p4 }
 0x53a   : > { %p1606_p10 = pnand %p1605_p3, %p1601_p8 }
 0x53c   : > { %1609 = shalt.err (!%p1606_p10)
}
 0x53d   : > { %s1695_s28 = smov 128  }
 0x53e   : > { %1328 = dma.vmem_to_hbm [thread:$0]  (%p1826_p0), %s1973_s6, 256, %s1978_s27, %s1041_s1, %s1695_s28, %s1695_s28, %s1691_s17  }
 0x53f PF: > { %s1071_s30 = sand.u32 1, %s1652_s18   ;;  %p2051_p2 = scmp.ne.s32.totalorder %s2042_s29, 0 }
 0x540   : > { %p2052_p11 = scmp.ge.s32.totalorder %s1672_s23, 2  ;;  %s1072_s7 = scalar_lea.sflag [#allocation5], %s1071_s30 }
 0x542   : > { %p1345_p7 = pnand %p2052_p11, %p2051_p2 }
 0x544   : > { %p1346_p6 = pneg %p1345_p7 }
 0x546   : > { %1647 = dma.done.wait (%p1346_p6), %s1072_s7, 256  }
 0x547   : > { %1649 = vsyncadd (%p1346_p6), %s1072_s7, 4294967040  ;;  %s23_s23 = sadd.s32 1, %s1672_s23   ;;  %s2053_s18 = smov %s1656_s19 }
 0x548   : > { %p20_p9 = scmp.ge.s32.totalorder %s23_s23, 4   ;;  %s2054_s19 = smov %s1660_s20 }
 0x549   : > { %s2055_s20 = smov %s1838_s15  ;;  %s2056_s21 = smov %s1668_s22 }
 0x54a   : > { %s2057_s22 = smov %s2059_s13  ;;  %22 = sbr.rel (!%p20_p9) target bundleno = 10 (0xa), region = 102 }
 0x54f   :  { %1077 = vsyncpa [#allocation4], 1 }
 0x550   :  { %1079 = vsyncpa [#allocation4 + $0x1], 1 }
 0x551   :  { %1080 = vsyncpa [#allocation7], 1 }
 0x552   :  { %1081 = vsyncpa [#allocation10], 1 }
 0x553   :  { %1082 = vsyncpa [#allocation5], 1 }
 0x554   :  { %1084 = vsyncpa [#allocation5 + $0x1], 1 }

</bundles_post_ra>
